<compile_context>
chip_gen: v6e
topology: v6e:2x2x1
jax: 0.10.0
libtpu: 0.0.40
codegen_flags: <defaults>
</compile_context>

<pallas_src>
import functools

import jax
import jax.numpy as jnp
from jax.experimental import pallas as pl
from jax.experimental.pallas import tpu as pltpu

_LANES = 128
_SUBLANES = 8


def _round_up(v, m):
    return ((v + m - 1) // m) * m


# ---------------------------------------------------------------------------
# Fused kernel.
# Block layout: x (C, R, 128) logits planes, t (R, 128) integer targets,
# accumulators (C, 8, 128) float32 (resident across the tile axis).
# ---------------------------------------------------------------------------
def _wce_fused_kernel(x_ref, t_ref, s_ref, nll_ref, cnt_ref, *,
                      num_classes, ignore_index, hw, rows_per_tile,
                      tiles_per_chunk, needs_mask):
    j = pl.program_id(2)

    @pl.when(j == 0)
    def _init():
        s_ref[...] = jnp.zeros_like(s_ref)
        nll_ref[...] = jnp.zeros_like(nll_ref)
        cnt_ref[...] = jnp.zeros_like(cnt_ref)

    t = t_ref[...]                                         # (R, 128) integer
    xs = [x_ref[c].astype(jnp.float32) for c in range(num_classes)]

    # Per-pixel softmax statistics over the class axis: pure elementwise work
    # on dense (R, 128) planes (no cross-lane / cross-sublane traffic).
    m = xs[0]
    for c in range(1, num_classes):
        m = jnp.maximum(m, xs[c])
    es = [jnp.exp(xs[c] - m) for c in range(num_classes)]
    sum_e = es[0]
    for c in range(1, num_classes):
        sum_e = sum_e + es[c]
    inv = pl.reciprocal(sum_e, approx=True)                # EUP; ~2^-12 rel err
    logz = jnp.log(sum_e) + m                              # per-pixel log Z

    # Spatial validity of this tile (lane padding / ragged last tile).
    # Statically elided when the padded layout covers H*W exactly.
    if needs_mask:
        chunk = pl.program_id(1)
        base = (chunk * tiles_per_chunk + j) * (rows_per_tile * _LANES)
        row = jax.lax.broadcasted_iota(jnp.int32, t.shape, 0)
        lane = jax.lax.broadcasted_iota(jnp.int32, t.shape, 1)
        in_bounds = (base + row * _LANES + lane) < hw
    else:
        in_bounds = None

    def fold_rows(plane):
        # (R, 128) -> (8, 128) partial sum via vreg-aligned static slices
        # (pure VPU adds; lane/sublane reduction happens in the JAX epilogue).
        acc = plane[0:_SUBLANES]
        for r in range(1, rows_per_tile // _SUBLANES):
            acc = acc + plane[r * _SUBLANES:(r + 1) * _SUBLANES]
        return acc

    one = jnp.float32(1.0)
    zero = jnp.float32(0.0)
    for c in range(num_classes):
        # Per-class softmax mass (includes ignore_index pixels, exactly like
        # the reference _class_weights which never looks at the target).
        p_c = es[c] * inv
        if needs_mask:
            p_c = jnp.where(in_bounds, p_c, zero)          # select: NaN-safe
        s_ref[c] += fold_rows(p_c)

        if c == ignore_index:          # statically skip the ignored class
            continue
        sel = t == c                   # ignore_index pixels never match (c != ignore_index)
        if needs_mask:
            sel = jnp.logical_and(sel, in_bounds)
        # Use selects (not multiplies) so garbage lanes of a ragged last tile
        # cannot leak NaN/Inf into the accumulators.
        nll_ref[c] += fold_rows(jnp.where(sel, logz - xs[c], zero))
        cnt_ref[c] += fold_rows(jnp.where(sel, one, zero))


# ---------------------------------------------------------------------------
# Wrapper
# ---------------------------------------------------------------------------
def weighted_cross_entropy_loss(logits_nchw, target_nhw, *, ignore_index=-1):
    """Replicates WeightedCrossEntropyLoss.forward.

    logits_nchw : (N, C, H, W) float (any float dtype; upcast in-kernel)
    target_nhw  : (N, H, W)    integer class indices (ignore_index allowed)
    returns scalar float32 loss
    """
    N, C, H, W = logits_nchw.shape
    HW = H * W

    # ---- spatial plan: dense (rows, 128) lane layout -----------------------
    rows = pl.cdiv(HW, _LANES)
    rows_pad = _round_up(rows, _SUBLANES)      # keeps row folding vreg-aligned
    hw_pad = rows_pad * _LANES
    rows_per_tile = min(128, rows_pad)         # <=16K px (~0.25 MiB f32) / tile
    n_tiles = pl.cdiv(rows_pad, rows_per_tile)
    # v7x megacore: split the spatial tiles over a second "parallel" grid axis
    # so both TensorCores get work even at N == 1.  Only when it divides evenly
    # (no out-of-range tiles); harmless serial iteration on 1-core chips.
    n_chunks = 2 if (n_tiles >= 2 and n_tiles % 2 == 0) else 1
    tiles_per_chunk = n_tiles // n_chunks
    needs_mask = (hw_pad != HW) or (n_tiles * rows_per_tile != rows_pad)

    # ---- free reshapes (a pad copy only for ragged H*W) --------------------
    x = logits_nchw.reshape(N, C, HW)
    t = target_nhw.reshape(N, HW)
    if not jnp.issubdtype(t.dtype, jnp.integer):
        t = t.astype(jnp.int32)
    if hw_pad != HW:
        x = jnp.pad(x, ((0, 0), (0, 0), (0, hw_pad - HW)))
        # pad label C: never a real class; padded pixels are also masked out.
        t = jnp.pad(t, ((0, 0), (0, hw_pad - HW)), constant_values=C)
    x = x.reshape(N, C, rows_pad, _LANES)
    t = t.reshape(N, rows_pad, _LANES)

    kernel = functools.partial(
        _wce_fused_kernel, num_classes=C, ignore_index=ignore_index, hw=HW,
        rows_per_tile=rows_per_tile, tiles_per_chunk=tiles_per_chunk,
        needs_mask=needs_mask)

    acc_shape = jax.ShapeDtypeStruct((N, n_chunks, C, _SUBLANES, _LANES),
                                     jnp.float32)
    acc_spec = pl.BlockSpec((None, None, C, _SUBLANES, _LANES),
                            lambda n, ch, j: (n, ch, 0, 0, 0))

    # Explicit VMEM budget: double-buffered inputs + resident accumulators
    # + generous elementwise-scratch headroom (well under every chip's limit).
    x_bytes = C * rows_per_tile * _LANES * x.dtype.itemsize
    t_bytes = rows_per_tile * _LANES * t.dtype.itemsize
    acc_bytes = 3 * C * _SUBLANES * _LANES * 4
    vmem_limit = int(2 * (x_bytes + t_bytes) + 2 * acc_bytes + (8 << 20))

    s_sum, nll_sum, cnt_sum = pl.pallas_call(
        kernel,
        out_shape=(acc_shape, acc_shape, acc_shape),
        grid_spec=pltpu.PrefetchScalarGridSpec(
            num_scalar_prefetch=0,
            grid=(N, n_chunks, tiles_per_chunk),
            in_specs=[
                pl.BlockSpec((None, C, rows_per_tile, _LANES),
                             lambda n, ch, j: (n, 0, ch * tiles_per_chunk + j, 0)),
                pl.BlockSpec((None, rows_per_tile, _LANES),
                             lambda n, ch, j: (n, ch * tiles_per_chunk + j, 0)),
            ],
            out_specs=(acc_spec, acc_spec, acc_spec),
        ),
        compiler_params=pltpu.CompilerParams(
            dimension_semantics=("parallel", "parallel", "arbitrary"),
            vmem_limit_bytes=vmem_limit),
    )(x, t)

    # Tiny epilogue in plain JAX.
    s = jnp.sum(s_sum, axis=(0, 1, 3, 4))          # (C,) per-class softmax mass
    nll_c = jnp.sum(nll_sum, axis=(0, 1, 3, 4))    # (C,)
    cnt_c = jnp.sum(cnt_sum, axis=(0, 1, 3, 4))    # (C,)

    total = jnp.float32(N * HW)
    w = (total - s) / s                            # == sum(1-p)/sum(p) per class
    return jnp.sum(w * nll_c) / jnp.sum(w * cnt_c)


# ---------------------------------------------------------------------------
# Pure-JAX reference (mirrors the PyTorch semantics) for a correctness check.
# ---------------------------------------------------------------------------
def _reference_wce(logits_nchw, target_nhw, ignore_index=-1):
    N, C, H, W = logits_nchw.shape
    x = jnp.transpose(logits_nchw, (0, 2, 3, 1)).reshape(-1, C).astype(jnp.float32)
    t = target_nhw.reshape(-1).astype(jnp.int32)
    M = x.shape[0]

    p = jax.nn.softmax(x, axis=-1)
    s = p.sum(axis=0)                                   # (C,)
    w = (M - s) / s                                     # (C,)

    logp = jax.nn.log_softmax(x, axis=-1)
    valid = (t != ignore_index)
    t_safe = jnp.where(valid, t, 0)
    nll = -jnp.take_along_axis(logp, t_safe[:, None], axis=-1)[:, 0]
    w_row = w[t_safe]
    vm = valid.astype(jnp.float32)
    return jnp.sum(w_row * nll * vm) / jnp.sum(w_row * vm)


def _run_case(name, key, n, c, h, w, dtype, ignore_frac):
    k1, k2, k3 = jax.random.split(key, 3)
    logits = (jax.random.normal(k1, (n, c, h, w), dtype=jnp.float32) * 2.0
              ).astype(dtype)
    target = jax.random.randint(k2, (n, h, w), 0, c, dtype=jnp.int32)
    if ignore_frac > 0:
        ign = jax.random.bernoulli(k3, ignore_frac, (n, h, w))
        target = jnp.where(ign, jnp.int32(-1), target)

    loss = jax.block_until_ready(
        weighted_cross_entropy_loss(logits, target, ignore_index=-1))
    ref = jax.block_until_ready(_reference_wce(logits, target, ignore_index=-1))
    # approx=True reciprocal only perturbs the class-weight statistic
    # (~2^-12 relative); tolerance loosened accordingly.
    assert jnp.allclose(loss, ref, rtol=1e-3, atol=1e-5), (name, loss, ref)
    return float(loss)


if __name__ == "__main__":
    key = jax.random.PRNGKey(0)
    k1, k2, k3 = jax.random.split(key, 3)

    # mask path (HW=256 padded to 8x128 rows), ignore_index pixels present
    _run_case("small_f32", k1, 2, 4, 16, 16, jnp.float32, 0.1)
    # static no-mask path (HW=1024 fills 8x128 rows exactly), bf16 logits
    _run_case("bf16_nomask", k2, 1, 4, 32, 32, jnp.bfloat16, 0.0)
    # chunked path (200 rows -> two 128-row tiles: megacore split + ragged tail)
    _run_case("chunked", k3, 1, 4, 160, 160, jnp.float32, 0.05)

    print("KERNEL_OK")
</pallas_src>

<mosaic_0001>
module attributes {stable_mosaic.version = 11 : i64} {
  func.func @_wce_fused_kernel(%arg0: i32, %arg1: i32, %arg2: i32, %arg3: memref<1x4x8x128xf32, #tpu.memory_space<vmem>>, %arg4: memref<1x8x128xi32, #tpu.memory_space<vmem>>, %arg5: memref<1x1x4x8x128xf32, #tpu.memory_space<vmem>>, %arg6: memref<1x1x4x8x128xf32, #tpu.memory_space<vmem>>, %arg7: memref<1x1x4x8x128xf32, #tpu.memory_space<vmem>>) attributes {dimension_semantics = [#tpu.dimension_semantics<parallel>, #tpu.dimension_semantics<parallel>, #tpu.dimension_semantics<arbitrary>], iteration_bounds = array<i64: 2, 1, 1>, scalar_prefetch = 0 : i64, scratch_operands = 0 : i64, tpu.core_type = #tpu.core_type<tc>, window_params = [{transform_indices = @transform_0, window_bounds = array<i64: 1, 4, 8, 128>}, {transform_indices = @transform_1, window_bounds = array<i64: 1, 8, 128>}, {transform_indices = @transform_2, window_bounds = array<i64: 1, 1, 4, 8, 128>}, {transform_indices = @transform_3, window_bounds = array<i64: 1, 1, 4, 8, 128>}, {transform_indices = @transform_4, window_bounds = array<i64: 1, 1, 4, 8, 128>}]} {
    %c0_i32 = arith.constant 0 : i32
    %0 = arith.cmpi eq, %arg2, %c0_i32 : i32
    %1 = arith.extui %0 : i1 to i32
    %c0_i32_0 = arith.constant 0 : i32
    %2 = arith.cmpi ne, %1, %c0_i32_0 : i32
    scf.if %2 {
      %cst_153 = arith.constant 0.000000e+00 : f32
      %162 = vector.broadcast %cst_153 : f32 to vector<4x8x128xf32>
      %c0_154 = arith.constant 0 : index
      %c0_155 = arith.constant 0 : index
      %c0_156 = arith.constant 0 : index
      %c0_157 = arith.constant 0 : index
      %c0_158 = arith.constant 0 : index
      %163 = vector.load %arg5[%c0_154, %c0_155, %c0_156, %c0_157, %c0_158] : memref<1x1x4x8x128xf32, #tpu.memory_space<vmem>>, vector<1x1x4x8x128xf32>
      %164 = vector.shape_cast %163 : vector<1x1x4x8x128xf32> to vector<4x8x128xf32>
      %165 = vector.shape_cast %162 : vector<4x8x128xf32> to vector<1x1x4x8x128xf32>
      tpu.vector_store %arg5[%c0_154, %c0_155, %c0_156, %c0_157, %c0_158], %165 {strides = array<i32>} : memref<1x1x4x8x128xf32, #tpu.memory_space<vmem>>, vector<1x1x4x8x128xf32>,
      %cst_159 = arith.constant 0.000000e+00 : f32
      %166 = vector.broadcast %cst_159 : f32 to vector<4x8x128xf32>
      %c0_160 = arith.constant 0 : index
      %c0_161 = arith.constant 0 : index
      %c0_162 = arith.constant 0 : index
      %c0_163 = arith.constant 0 : index
      %c0_164 = arith.constant 0 : index
      %167 = vector.load %arg6[%c0_160, %c0_161, %c0_162, %c0_163, %c0_164] : memref<1x1x4x8x128xf32, #tpu.memory_space<vmem>>, vector<1x1x4x8x128xf32>
      %168 = vector.shape_cast %167 : vector<1x1x4x8x128xf32> to vector<4x8x128xf32>
      %169 = vector.shape_cast %166 : vector<4x8x128xf32> to vector<1x1x4x8x128xf32>
      tpu.vector_store %arg6[%c0_160, %c0_161, %c0_162, %c0_163, %c0_164], %169 {strides = array<i32>} : memref<1x1x4x8x128xf32, #tpu.memory_space<vmem>>, vector<1x1x4x8x128xf32>,
      %cst_165 = arith.constant 0.000000e+00 : f32
      %170 = vector.broadcast %cst_165 : f32 to vector<4x8x128xf32>
      %c0_166 = arith.constant 0 : index
      %c0_167 = arith.constant 0 : index
      %c0_168 = arith.constant 0 : index
      %c0_169 = arith.constant 0 : index
      %c0_170 = arith.constant 0 : index
      %171 = vector.load %arg7[%c0_166, %c0_167, %c0_168, %c0_169, %c0_170] : memref<1x1x4x8x128xf32, #tpu.memory_space<vmem>>, vector<1x1x4x8x128xf32>
      %172 = vector.shape_cast %171 : vector<1x1x4x8x128xf32> to vector<4x8x128xf32>
      %173 = vector.shape_cast %170 : vector<4x8x128xf32> to vector<1x1x4x8x128xf32>
      tpu.vector_store %arg7[%c0_166, %c0_167, %c0_168, %c0_169, %c0_170], %173 {strides = array<i32>} : memref<1x1x4x8x128xf32, #tpu.memory_space<vmem>>, vector<1x1x4x8x128xf32>,
    } else {
    }
    %c0 = arith.constant 0 : index
    %c0_1 = arith.constant 0 : index
    %c0_2 = arith.constant 0 : index
    %3 = vector.load %arg4[%c0, %c0_1, %c0_2] : memref<1x8x128xi32, #tpu.memory_space<vmem>>, vector<1x8x128xi32>
    %4 = vector.shape_cast %3 : vector<1x8x128xi32> to vector<8x128xi32>
    %c0_3 = arith.constant 0 : index
    %c0_4 = arith.constant 0 : index
    %c0_5 = arith.constant 0 : index
    %c0_6 = arith.constant 0 : index
    %5 = vector.load %arg3[%c0_3, %c0_4, %c0_5, %c0_6] : memref<1x4x8x128xf32, #tpu.memory_space<vmem>>, vector<1x1x8x128xf32>
    %6 = vector.shape_cast %5 : vector<1x1x8x128xf32> to vector<8x128xf32>
    %c0_7 = arith.constant 0 : index
    %c1 = arith.constant 1 : index
    %c0_8 = arith.constant 0 : index
    %c0_9 = arith.constant 0 : index
    %7 = vector.load %arg3[%c0_7, %c1, %c0_8, %c0_9] : memref<1x4x8x128xf32, #tpu.memory_space<vmem>>, vector<1x1x8x128xf32>
    %8 = vector.shape_cast %7 : vector<1x1x8x128xf32> to vector<8x128xf32>
    %c0_10 = arith.constant 0 : index
    %c2 = arith.constant 2 : index
    %c0_11 = arith.constant 0 : index
    %c0_12 = arith.constant 0 : index
    %9 = vector.load %arg3[%c0_10, %c2, %c0_11, %c0_12] : memref<1x4x8x128xf32, #tpu.memory_space<vmem>>, vector<1x1x8x128xf32>
    %10 = vector.shape_cast %9 : vector<1x1x8x128xf32> to vector<8x128xf32>
    %c0_13 = arith.constant 0 : index
    %c3 = arith.constant 3 : index
    %c0_14 = arith.constant 0 : index
    %c0_15 = arith.constant 0 : index
    %11 = vector.load %arg3[%c0_13, %c3, %c0_14, %c0_15] : memref<1x4x8x128xf32, #tpu.memory_space<vmem>>, vector<1x1x8x128xf32>
    %12 = vector.shape_cast %11 : vector<1x1x8x128xf32> to vector<8x128xf32>
    %13 = arith.maximumf %6, %8 : vector<8x128xf32>
    %14 = arith.maximumf %13, %10 : vector<8x128xf32>
    %15 = arith.maximumf %14, %12 : vector<8x128xf32>
    %16 = arith.subf %6, %15 : vector<8x128xf32>
    %17 = math.exp %16 : vector<8x128xf32>
    %18 = arith.subf %8, %15 : vector<8x128xf32>
    %19 = math.exp %18 : vector<8x128xf32>
    %20 = arith.subf %10, %15 : vector<8x128xf32>
    %21 = math.exp %20 : vector<8x128xf32>
    %22 = arith.subf %12, %15 : vector<8x128xf32>
    %23 = math.exp %22 : vector<8x128xf32>
    %24 = arith.addf %17, %19 : vector<8x128xf32>
    %25 = arith.addf %24, %21 : vector<8x128xf32>
    %26 = arith.addf %25, %23 : vector<8x128xf32>
    %27 = tpu.reciprocal %26 {approx = true} : vector<8x128xf32> -> vector<8x128xf32>
    %28 = math.log %26 : vector<8x128xf32>
    %29 = arith.addf %28, %15 : vector<8x128xf32>
    %c1_i32 = arith.constant 1 : i32
    %30 = arith.muli %arg1, %c1_i32 : i32
    %31 = arith.addi %30, %arg2 : i32
    %c1024_i32 = arith.constant 1024 : i32
    %32 = arith.muli %31, %c1024_i32 : i32
    %33 = tpu.iota {dimensions = array<i32: 0>} : vector<8x128xi32>
    %34 = tpu.iota {dimensions = array<i32: 1>} : vector<8x128xi32>
    %c128_i32 = arith.constant 128 : i32
    %35 = vector.broadcast %c128_i32 : i32 to vector<8x128xi32>
    %36 = arith.muli %33, %35 : vector<8x128xi32>
    %37 = vector.broadcast %32 : i32 to vector<8x128xi32>
    %38 = arith.addi %37, %36 : vector<8x128xi32>
    %39 = arith.addi %38, %34 : vector<8x128xi32>
    %c256_i32 = arith.constant 256 : i32
    %40 = vector.broadcast %c256_i32 : i32 to vector<8x128xi32>
    %41 = arith.cmpi slt, %39, %40 : vector<8x128xi32>
    %42 = arith.mulf %17, %27 : vector<8x128xf32>
    %cst = arith.constant 0.000000e+00 : f32
    %43 = vector.broadcast %cst : f32 to vector<8x128xf32>
    %44 = arith.select %41, %42, %43 : vector<8x128xi1>, vector<8x128xf32>
    %c0_16 = arith.constant 0 : index
    %c0_17 = arith.constant 0 : index
    %c0_18 = arith.constant 0 : index
    %c0_19 = arith.constant 0 : index
    %c0_20 = arith.constant 0 : index
    %45 = vector.load %arg5[%c0_16, %c0_17, %c0_18, %c0_19, %c0_20] : memref<1x1x4x8x128xf32, #tpu.memory_space<vmem>>, vector<1x1x1x8x128xf32>
    %46 = vector.shape_cast %45 : vector<1x1x1x8x128xf32> to vector<8x128xf32>
    %47 = arith.addf %46, %44 : vector<8x128xf32>
    %c0_21 = arith.constant 0 : index
    %c0_22 = arith.constant 0 : index
    %c0_23 = arith.constant 0 : index
    %c0_24 = arith.constant 0 : index
    %c0_25 = arith.constant 0 : index
    %48 = vector.load %arg5[%c0_21, %c0_22, %c0_23, %c0_24, %c0_25] : memref<1x1x4x8x128xf32, #tpu.memory_space<vmem>>, vector<1x1x1x8x128xf32>
    %49 = vector.shape_cast %48 : vector<1x1x1x8x128xf32> to vector<8x128xf32>
    %50 = vector.shape_cast %47 : vector<8x128xf32> to vector<1x1x1x8x128xf32>
    tpu.vector_store %arg5[%c0_21, %c0_22, %c0_23, %c0_24, %c0_25], %50 {strides = array<i32>} : memref<1x1x4x8x128xf32, #tpu.memory_space<vmem>>, vector<1x1x1x8x128xf32>,
    %c0_i32_26 = arith.constant 0 : i32
    %51 = vector.broadcast %c0_i32_26 : i32 to vector<8x128xi32>
    %52 = arith.cmpi eq, %4, %51 : vector<8x128xi32>
    %53 = arith.andi %52, %41 : vector<8x128xi1>
    %c0_27 = arith.constant 0 : index
    %c0_28 = arith.constant 0 : index
    %c0_29 = arith.constant 0 : index
    %c0_30 = arith.constant 0 : index
    %c0_31 = arith.constant 0 : index
    %54 = vector.load %arg6[%c0_27, %c0_28, %c0_29, %c0_30, %c0_31] : memref<1x1x4x8x128xf32, #tpu.memory_space<vmem>>, vector<1x1x1x8x128xf32>
    %55 = vector.shape_cast %54 : vector<1x1x1x8x128xf32> to vector<8x128xf32>
    %56 = arith.subf %29, %6 : vector<8x128xf32>
    %cst_32 = arith.constant 0.000000e+00 : f32
    %57 = vector.broadcast %cst_32 : f32 to vector<8x128xf32>
    %58 = arith.select %53, %56, %57 : vector<8x128xi1>, vector<8x128xf32>
    %59 = arith.addf %55, %58 : vector<8x128xf32>
    %c0_33 = arith.constant 0 : index
    %c0_34 = arith.constant 0 : index
    %c0_35 = arith.constant 0 : index
    %c0_36 = arith.constant 0 : index
    %c0_37 = arith.constant 0 : index
    %60 = vector.load %arg6[%c0_33, %c0_34, %c0_35, %c0_36, %c0_37] : memref<1x1x4x8x128xf32, #tpu.memory_space<vmem>>, vector<1x1x1x8x128xf32>
    %61 = vector.shape_cast %60 : vector<1x1x1x8x128xf32> to vector<8x128xf32>
    %62 = vector.shape_cast %59 : vector<8x128xf32> to vector<1x1x1x8x128xf32>
    tpu.vector_store %arg6[%c0_33, %c0_34, %c0_35, %c0_36, %c0_37], %62 {strides = array<i32>} : memref<1x1x4x8x128xf32, #tpu.memory_space<vmem>>, vector<1x1x1x8x128xf32>,
    %c0_38 = arith.constant 0 : index
    %c0_39 = arith.constant 0 : index
    %c0_40 = arith.constant 0 : index
    %c0_41 = arith.constant 0 : index
    %c0_42 = arith.constant 0 : index
    %63 = vector.load %arg7[%c0_38, %c0_39, %c0_40, %c0_41, %c0_42] : memref<1x1x4x8x128xf32, #tpu.memory_space<vmem>>, vector<1x1x1x8x128xf32>
    %64 = vector.shape_cast %63 : vector<1x1x1x8x128xf32> to vector<8x128xf32>
    %cst_43 = arith.constant 1.000000e+00 : f32
    %cst_44 = arith.constant 0.000000e+00 : f32
    %65 = vector.broadcast %cst_43 : f32 to vector<8x128xf32>
    %66 = vector.broadcast %cst_44 : f32 to vector<8x128xf32>
    %67 = arith.select %53, %65, %66 : vector<8x128xi1>, vector<8x128xf32>
    %68 = arith.addf %64, %67 : vector<8x128xf32>
    %c0_45 = arith.constant 0 : index
    %c0_46 = arith.constant 0 : index
    %c0_47 = arith.constant 0 : index
    %c0_48 = arith.constant 0 : index
    %c0_49 = arith.constant 0 : index
    %69 = vector.load %arg7[%c0_45, %c0_46, %c0_47, %c0_48, %c0_49] : memref<1x1x4x8x128xf32, #tpu.memory_space<vmem>>, vector<1x1x1x8x128xf32>
    %70 = vector.shape_cast %69 : vector<1x1x1x8x128xf32> to vector<8x128xf32>
    %71 = vector.shape_cast %68 : vector<8x128xf32> to vector<1x1x1x8x128xf32>
    tpu.vector_store %arg7[%c0_45, %c0_46, %c0_47, %c0_48, %c0_49], %71 {strides = array<i32>} : memref<1x1x4x8x128xf32, #tpu.memory_space<vmem>>, vector<1x1x1x8x128xf32>,
    %72 = arith.mulf %19, %27 : vector<8x128xf32>
    %cst_50 = arith.constant 0.000000e+00 : f32
    %73 = vector.broadcast %cst_50 : f32 to vector<8x128xf32>
    %74 = arith.select %41, %72, %73 : vector<8x128xi1>, vector<8x128xf32>
    %c0_51 = arith.constant 0 : index
    %c0_52 = arith.constant 0 : index
    %c1_53 = arith.constant 1 : index
    %c0_54 = arith.constant 0 : index
    %c0_55 = arith.constant 0 : index
    %75 = vector.load %arg5[%c0_51, %c0_52, %c1_53, %c0_54, %c0_55] : memref<1x1x4x8x128xf32, #tpu.memory_space<vmem>>, vector<1x1x1x8x128xf32>
    %76 = vector.shape_cast %75 : vector<1x1x1x8x128xf32> to vector<8x128xf32>
    %77 = arith.addf %76, %74 : vector<8x128xf32>
    %c0_56 = arith.constant 0 : index
    %c0_57 = arith.constant 0 : index
    %c1_58 = arith.constant 1 : index
    %c0_59 = arith.constant 0 : index
    %c0_60 = arith.constant 0 : index
    %78 = vector.load %arg5[%c0_56, %c0_57, %c1_58, %c0_59, %c0_60] : memref<1x1x4x8x128xf32, #tpu.memory_space<vmem>>, vector<1x1x1x8x128xf32>
    %79 = vector.shape_cast %78 : vector<1x1x1x8x128xf32> to vector<8x128xf32>
    %80 = vector.shape_cast %77 : vector<8x128xf32> to vector<1x1x1x8x128xf32>
    tpu.vector_store %arg5[%c0_56, %c0_57, %c1_58, %c0_59, %c0_60], %80 {strides = array<i32>} : memref<1x1x4x8x128xf32, #tpu.memory_space<vmem>>, vector<1x1x1x8x128xf32>,
    %c1_i32_61 = arith.constant 1 : i32
    %81 = vector.broadcast %c1_i32_61 : i32 to vector<8x128xi32>
    %82 = arith.cmpi eq, %4, %81 : vector<8x128xi32>
    %83 = arith.andi %82, %41 : vector<8x128xi1>
    %c0_62 = arith.constant 0 : index
    %c0_63 = arith.constant 0 : index
    %c1_64 = arith.constant 1 : index
    %c0_65 = arith.constant 0 : index
    %c0_66 = arith.constant 0 : index
    %84 = vector.load %arg6[%c0_62, %c0_63, %c1_64, %c0_65, %c0_66] : memref<1x1x4x8x128xf32, #tpu.memory_space<vmem>>, vector<1x1x1x8x128xf32>
    %85 = vector.shape_cast %84 : vector<1x1x1x8x128xf32> to vector<8x128xf32>
    %86 = arith.subf %29, %8 : vector<8x128xf32>
    %cst_67 = arith.constant 0.000000e+00 : f32
    %87 = vector.broadcast %cst_67 : f32 to vector<8x128xf32>
    %88 = arith.select %83, %86, %87 : vector<8x128xi1>, vector<8x128xf32>
    %89 = arith.addf %85, %88 : vector<8x128xf32>
    %c0_68 = arith.constant 0 : index
    %c0_69 = arith.constant 0 : index
    %c1_70 = arith.constant 1 : index
    %c0_71 = arith.constant 0 : index
    %c0_72 = arith.constant 0 : index
    %90 = vector.load %arg6[%c0_68, %c0_69, %c1_70, %c0_71, %c0_72] : memref<1x1x4x8x128xf32, #tpu.memory_space<vmem>>, vector<1x1x1x8x128xf32>
    %91 = vector.shape_cast %90 : vector<1x1x1x8x128xf32> to vector<8x128xf32>
    %92 = vector.shape_cast %89 : vector<8x128xf32> to vector<1x1x1x8x128xf32>
    tpu.vector_store %arg6[%c0_68, %c0_69, %c1_70, %c0_71, %c0_72], %92 {strides = array<i32>} : memref<1x1x4x8x128xf32, #tpu.memory_space<vmem>>, vector<1x1x1x8x128xf32>,
    %c0_73 = arith.constant 0 : index
    %c0_74 = arith.constant 0 : index
    %c1_75 = arith.constant 1 : index
    %c0_76 = arith.constant 0 : index
    %c0_77 = arith.constant 0 : index
    %93 = vector.load %arg7[%c0_73, %c0_74, %c1_75, %c0_76, %c0_77] : memref<1x1x4x8x128xf32, #tpu.memory_space<vmem>>, vector<1x1x1x8x128xf32>
    %94 = vector.shape_cast %93 : vector<1x1x1x8x128xf32> to vector<8x128xf32>
    %cst_78 = arith.constant 1.000000e+00 : f32
    %cst_79 = arith.constant 0.000000e+00 : f32
    %95 = vector.broadcast %cst_78 : f32 to vector<8x128xf32>
    %96 = vector.broadcast %cst_79 : f32 to vector<8x128xf32>
    %97 = arith.select %83, %95, %96 : vector<8x128xi1>, vector<8x128xf32>
    %98 = arith.addf %94, %97 : vector<8x128xf32>
    %c0_80 = arith.constant 0 : index
    %c0_81 = arith.constant 0 : index
    %c1_82 = arith.constant 1 : index
    %c0_83 = arith.constant 0 : index
    %c0_84 = arith.constant 0 : index
    %99 = vector.load %arg7[%c0_80, %c0_81, %c1_82, %c0_83, %c0_84] : memref<1x1x4x8x128xf32, #tpu.memory_space<vmem>>, vector<1x1x1x8x128xf32>
    %100 = vector.shape_cast %99 : vector<1x1x1x8x128xf32> to vector<8x128xf32>
    %101 = vector.shape_cast %98 : vector<8x128xf32> to vector<1x1x1x8x128xf32>
    tpu.vector_store %arg7[%c0_80, %c0_81, %c1_82, %c0_83, %c0_84], %101 {strides = array<i32>} : memref<1x1x4x8x128xf32, #tpu.memory_space<vmem>>, vector<1x1x1x8x128xf32>,
    %102 = arith.mulf %21, %27 : vector<8x128xf32>
    %cst_85 = arith.constant 0.000000e+00 : f32
    %103 = vector.broadcast %cst_85 : f32 to vector<8x128xf32>
    %104 = arith.select %41, %102, %103 : vector<8x128xi1>, vector<8x128xf32>
    %c0_86 = arith.constant 0 : index
    %c0_87 = arith.constant 0 : index
    %c2_88 = arith.constant 2 : index
    %c0_89 = arith.constant 0 : index
    %c0_90 = arith.constant 0 : index
    %105 = vector.load %arg5[%c0_86, %c0_87, %c2_88, %c0_89, %c0_90] : memref<1x1x4x8x128xf32, #tpu.memory_space<vmem>>, vector<1x1x1x8x128xf32>
    %106 = vector.shape_cast %105 : vector<1x1x1x8x128xf32> to vector<8x128xf32>
    %107 = arith.addf %106, %104 : vector<8x128xf32>
    %c0_91 = arith.constant 0 : index
    %c0_92 = arith.constant 0 : index
    %c2_93 = arith.constant 2 : index
    %c0_94 = arith.constant 0 : index
    %c0_95 = arith.constant 0 : index
    %108 = vector.load %arg5[%c0_91, %c0_92, %c2_93, %c0_94, %c0_95] : memref<1x1x4x8x128xf32, #tpu.memory_space<vmem>>, vector<1x1x1x8x128xf32>
    %109 = vector.shape_cast %108 : vector<1x1x1x8x128xf32> to vector<8x128xf32>
    %110 = vector.shape_cast %107 : vector<8x128xf32> to vector<1x1x1x8x128xf32>
    tpu.vector_store %arg5[%c0_91, %c0_92, %c2_93, %c0_94, %c0_95], %110 {strides = array<i32>} : memref<1x1x4x8x128xf32, #tpu.memory_space<vmem>>, vector<1x1x1x8x128xf32>,
    %c2_i32 = arith.constant 2 : i32
    %111 = vector.broadcast %c2_i32 : i32 to vector<8x128xi32>
    %112 = arith.cmpi eq, %4, %111 : vector<8x128xi32>
    %113 = arith.andi %112, %41 : vector<8x128xi1>
    %c0_96 = arith.constant 0 : index
    %c0_97 = arith.constant 0 : index
    %c2_98 = arith.constant 2 : index
    %c0_99 = arith.constant 0 : index
    %c0_100 = arith.constant 0 : index
    %114 = vector.load %arg6[%c0_96, %c0_97, %c2_98, %c0_99, %c0_100] : memref<1x1x4x8x128xf32, #tpu.memory_space<vmem>>, vector<1x1x1x8x128xf32>
    %115 = vector.shape_cast %114 : vector<1x1x1x8x128xf32> to vector<8x128xf32>
    %116 = arith.subf %29, %10 : vector<8x128xf32>
    %cst_101 = arith.constant 0.000000e+00 : f32
    %117 = vector.broadcast %cst_101 : f32 to vector<8x128xf32>
    %118 = arith.select %113, %116, %117 : vector<8x128xi1>, vector<8x128xf32>
    %119 = arith.addf %115, %118 : vector<8x128xf32>
    %c0_102 = arith.constant 0 : index
    %c0_103 = arith.constant 0 : index
    %c2_104 = arith.constant 2 : index
    %c0_105 = arith.constant 0 : index
    %c0_106 = arith.constant 0 : index
    %120 = vector.load %arg6[%c0_102, %c0_103, %c2_104, %c0_105, %c0_106] : memref<1x1x4x8x128xf32, #tpu.memory_space<vmem>>, vector<1x1x1x8x128xf32>
    %121 = vector.shape_cast %120 : vector<1x1x1x8x128xf32> to vector<8x128xf32>
    %122 = vector.shape_cast %119 : vector<8x128xf32> to vector<1x1x1x8x128xf32>
    tpu.vector_store %arg6[%c0_102, %c0_103, %c2_104, %c0_105, %c0_106], %122 {strides = array<i32>} : memref<1x1x4x8x128xf32, #tpu.memory_space<vmem>>, vector<1x1x1x8x128xf32>,
    %c0_107 = arith.constant 0 : index
    %c0_108 = arith.constant 0 : index
    %c2_109 = arith.constant 2 : index
    %c0_110 = arith.constant 0 : index
    %c0_111 = arith.constant 0 : index
    %123 = vector.load %arg7[%c0_107, %c0_108, %c2_109, %c0_110, %c0_111] : memref<1x1x4x8x128xf32, #tpu.memory_space<vmem>>, vector<1x1x1x8x128xf32>
    %124 = vector.shape_cast %123 : vector<1x1x1x8x128xf32> to vector<8x128xf32>
    %cst_112 = arith.constant 1.000000e+00 : f32
    %cst_113 = arith.constant 0.000000e+00 : f32
    %125 = vector.broadcast %cst_112 : f32 to vector<8x128xf32>
    %126 = vector.broadcast %cst_113 : f32 to vector<8x128xf32>
    %127 = arith.select %113, %125, %126 : vector<8x128xi1>, vector<8x128xf32>
    %128 = arith.addf %124, %127 : vector<8x128xf32>
    %c0_114 = arith.constant 0 : index
    %c0_115 = arith.constant 0 : index
    %c2_116 = arith.constant 2 : index
    %c0_117 = arith.constant 0 : index
    %c0_118 = arith.constant 0 : index
    %129 = vector.load %arg7[%c0_114, %c0_115, %c2_116, %c0_117, %c0_118] : memref<1x1x4x8x128xf32, #tpu.memory_space<vmem>>, vector<1x1x1x8x128xf32>
    %130 = vector.shape_cast %129 : vector<1x1x1x8x128xf32> to vector<8x128xf32>
    %131 = vector.shape_cast %128 : vector<8x128xf32> to vector<1x1x1x8x128xf32>
    tpu.vector_store %arg7[%c0_114, %c0_115, %c2_116, %c0_117, %c0_118], %131 {strides = array<i32>} : memref<1x1x4x8x128xf32, #tpu.memory_space<vmem>>, vector<1x1x1x8x128xf32>,
    %132 = arith.mulf %23, %27 : vector<8x128xf32>
    %cst_119 = arith.constant 0.000000e+00 : f32
    %133 = vector.broadcast %cst_119 : f32 to vector<8x128xf32>
    %134 = arith.select %41, %132, %133 : vector<8x128xi1>, vector<8x128xf32>
    %c0_120 = arith.constant 0 : index
    %c0_121 = arith.constant 0 : index
    %c3_122 = arith.constant 3 : index
    %c0_123 = arith.constant 0 : index
    %c0_124 = arith.constant 0 : index
    %135 = vector.load %arg5[%c0_120, %c0_121, %c3_122, %c0_123, %c0_124] : memref<1x1x4x8x128xf32, #tpu.memory_space<vmem>>, vector<1x1x1x8x128xf32>
    %136 = vector.shape_cast %135 : vector<1x1x1x8x128xf32> to vector<8x128xf32>
    %137 = arith.addf %136, %134 : vector<8x128xf32>
    %c0_125 = arith.constant 0 : index
    %c0_126 = arith.constant 0 : index
    %c3_127 = arith.constant 3 : index
    %c0_128 = arith.constant 0 : index
    %c0_129 = arith.constant 0 : index
    %138 = vector.load %arg5[%c0_125, %c0_126, %c3_127, %c0_128, %c0_129] : memref<1x1x4x8x128xf32, #tpu.memory_space<vmem>>, vector<1x1x1x8x128xf32>
    %139 = vector.shape_cast %138 : vector<1x1x1x8x128xf32> to vector<8x128xf32>
    %140 = vector.shape_cast %137 : vector<8x128xf32> to vector<1x1x1x8x128xf32>
    tpu.vector_store %arg5[%c0_125, %c0_126, %c3_127, %c0_128, %c0_129], %140 {strides = array<i32>} : memref<1x1x4x8x128xf32, #tpu.memory_space<vmem>>, vector<1x1x1x8x128xf32>,
    %c3_i32 = arith.constant 3 : i32
    %141 = vector.broadcast %c3_i32 : i32 to vector<8x128xi32>
    %142 = arith.cmpi eq, %4, %141 : vector<8x128xi32>
    %143 = arith.andi %142, %41 : vector<8x128xi1>
    %c0_130 = arith.constant 0 : index
    %c0_131 = arith.constant 0 : index
    %c3_132 = arith.constant 3 : index
    %c0_133 = arith.constant 0 : index
    %c0_134 = arith.constant 0 : index
    %144 = vector.load %arg6[%c0_130, %c0_131, %c3_132, %c0_133, %c0_134] : memref<1x1x4x8x128xf32, #tpu.memory_space<vmem>>, vector<1x1x1x8x128xf32>
    %145 = vector.shape_cast %144 : vector<1x1x1x8x128xf32> to vector<8x128xf32>
    %146 = arith.subf %29, %12 : vector<8x128xf32>
    %cst_135 = arith.constant 0.000000e+00 : f32
    %147 = vector.broadcast %cst_135 : f32 to vector<8x128xf32>
    %148 = arith.select %143, %146, %147 : vector<8x128xi1>, vector<8x128xf32>
    %149 = arith.addf %145, %148 : vector<8x128xf32>
    %c0_136 = arith.constant 0 : index
    %c0_137 = arith.constant 0 : index
    %c3_138 = arith.constant 3 : index
    %c0_139 = arith.constant 0 : index
    %c0_140 = arith.constant 0 : index
    %150 = vector.load %arg6[%c0_136, %c0_137, %c3_138, %c0_139, %c0_140] : memref<1x1x4x8x128xf32, #tpu.memory_space<vmem>>, vector<1x1x1x8x128xf32>
    %151 = vector.shape_cast %150 : vector<1x1x1x8x128xf32> to vector<8x128xf32>
    %152 = vector.shape_cast %149 : vector<8x128xf32> to vector<1x1x1x8x128xf32>
    tpu.vector_store %arg6[%c0_136, %c0_137, %c3_138, %c0_139, %c0_140], %152 {strides = array<i32>} : memref<1x1x4x8x128xf32, #tpu.memory_space<vmem>>, vector<1x1x1x8x128xf32>,
    %c0_141 = arith.constant 0 : index
    %c0_142 = arith.constant 0 : index
    %c3_143 = arith.constant 3 : index
    %c0_144 = arith.constant 0 : index
    %c0_145 = arith.constant 0 : index
    %153 = vector.load %arg7[%c0_141, %c0_142, %c3_143, %c0_144, %c0_145] : memref<1x1x4x8x128xf32, #tpu.memory_space<vmem>>, vector<1x1x1x8x128xf32>
    %154 = vector.shape_cast %153 : vector<1x1x1x8x128xf32> to vector<8x128xf32>
    %cst_146 = arith.constant 1.000000e+00 : f32
    %cst_147 = arith.constant 0.000000e+00 : f32
    %155 = vector.broadcast %cst_146 : f32 to vector<8x128xf32>
    %156 = vector.broadcast %cst_147 : f32 to vector<8x128xf32>
    %157 = arith.select %143, %155, %156 : vector<8x128xi1>, vector<8x128xf32>
    %158 = arith.addf %154, %157 : vector<8x128xf32>
    %c0_148 = arith.constant 0 : index
    %c0_149 = arith.constant 0 : index
    %c3_150 = arith.constant 3 : index
    %c0_151 = arith.constant 0 : index
    %c0_152 = arith.constant 0 : index
    %159 = vector.load %arg7[%c0_148, %c0_149, %c3_150, %c0_151, %c0_152] : memref<1x1x4x8x128xf32, #tpu.memory_space<vmem>>, vector<1x1x1x8x128xf32>
    %160 = vector.shape_cast %159 : vector<1x1x1x8x128xf32> to vector<8x128xf32>
    %161 = vector.shape_cast %158 : vector<8x128xf32> to vector<1x1x1x8x128xf32>
    tpu.vector_store %arg7[%c0_148, %c0_149, %c3_150, %c0_151, %c0_152], %161 {strides = array<i32>} : memref<1x1x4x8x128xf32, #tpu.memory_space<vmem>>, vector<1x1x1x8x128xf32>,
    return
  }
  func.func @transform_0(%arg0: i32, %arg1: i32, %arg2: i32) -> (i32, i32, i32, i32) {
    %c1_i32 = arith.constant 1 : i32
    %0 = arith.muli %arg1, %c1_i32 : i32
    %1 = arith.addi %0, %arg2 : i32
    %c0_i32 = arith.constant 0 : i32
    %c0_i32_0 = arith.constant 0 : i32
    %c0_i32_1 = arith.constant 0 : i32
    return %arg0, %c0_i32, %1, %c0_i32_0 : i32, i32, i32, i32
  }
  func.func @transform_1(%arg0: i32, %arg1: i32, %arg2: i32) -> (i32, i32, i32) {
    %c1_i32 = arith.constant 1 : i32
    %0 = arith.muli %arg1, %c1_i32 : i32
    %1 = arith.addi %0, %arg2 : i32
    %c0_i32 = arith.constant 0 : i32
    %c0_i32_0 = arith.constant 0 : i32
    return %arg0, %1, %c0_i32 : i32, i32, i32
  }
  func.func @transform_2(%arg0: i32, %arg1: i32, %arg2: i32) -> (i32, i32, i32, i32, i32) {
    %c0_i32 = arith.constant 0 : i32
    %c0_i32_0 = arith.constant 0 : i32
    %c0_i32_1 = arith.constant 0 : i32
    %c0_i32_2 = arith.constant 0 : i32
    return %arg0, %arg1, %c0_i32, %c0_i32_0, %c0_i32_1 : i32, i32, i32, i32, i32
  }
  func.func @transform_3(%arg0: i32, %arg1: i32, %arg2: i32) -> (i32, i32, i32, i32, i32) {
    %c0_i32 = arith.constant 0 : i32
    %c0_i32_0 = arith.constant 0 : i32
    %c0_i32_1 = arith.constant 0 : i32
    %c0_i32_2 = arith.constant 0 : i32
    return %arg0, %arg1, %c0_i32, %c0_i32_0, %c0_i32_1 : i32, i32, i32, i32, i32
  }
  func.func @transform_4(%arg0: i32, %arg1: i32, %arg2: i32) -> (i32, i32, i32, i32, i32) {
    %c0_i32 = arith.constant 0 : i32
    %c0_i32_0 = arith.constant 0 : i32
    %c0_i32_1 = arith.constant 0 : i32
    %c0_i32_2 = arith.constant 0 : i32
    return %arg0, %arg1, %c0_i32, %c0_i32_0, %c0_i32_1 : i32, i32, i32, i32, i32
  }
}

</mosaic_0001>

<bundles_post_ra>
// kernel: tpu_custom_call.1
= control target key start
LH: loop header
LB: loop body
LE: loop exit
PB: predicated region body
PF: predicated region fallthrough
CT: control target
= control target key end

     0   :  { %s1416_s0 = inlined_call_operand.hbm [shape: f32[2,4,8,128], index: 0, kind: input, shape index: {}]   ;;  %s1417_s1 = inlined_call_operand.hbm [shape: s32[2,8,128], index: 1, kind: input, shape index: {}]   ;;  %s1418_s2 = inlined_call_operand.hbm [shape: f32[2,1,4,8,128], index: 2, kind: output, shape index: {0}]   ;;  %s1419_s3 = inlined_call_operand.hbm [shape: f32[2,1,4,8,128], index: 3, kind: output, shape index: {1}]   ;;  %s1420_s4 = inlined_call_operand.hbm [shape: f32[2,1,4,8,128], index: 4, kind: output, shape index: {2}]  }
   0x1   :  { %1423 = sst [smem:[#allocation17_spill]] %s1416_s0 }
   0x2   :  { %10 = vsyncpa [#allocation3], 0 }
   0x3   :  { %12 = vsyncpa [#allocation3 + $0x1], 0 }
   0x4   :  { %13 = vsyncpa [#allocation6], 0 }
   0x5   :  { %15 = vsyncpa [#allocation6 + $0x1], 0 }
   0x6   :  { %16 = vsyncpa [#allocation4], 0 }
   0x7   :  { %18 = vsyncpa [#allocation4 + $0x1], 0 }
   0x8   :  { %19 = vsyncpa [#allocation9], 0 }
   0x9   :  { %21 = vsyncpa [#allocation9 + $0x1], 0  ;;  %s1062_s15 = smov 0   ;;  %s1064_s16 = smov 0  }
   0xa   :  { %s1066_s17 = smov 0   ;;  %s1068_s18 = smov 0  }
   0xb   :  { %s1070_s19 = smov 0   ;;  %s1072_s20 = smov 0  }
   0xc LB: > { %s1093_s21 = sadd.s32 4294967295, %s1025_s20   ;;  %s1421_s22 = sadd.s32 4294967294, %s1025_s20   ;;  %s1025_s20 = sphi %s1072_s20, %s27_s20   ;;  %s1021_s19 = sphi %s1070_s19, %s1448_s19   ;;  %s1017_s18 = sphi %s1068_s18, %s1447_s18   ;;  %s1013_s17 = sphi %s1066_s17, %s1446_s17   ;;  %s1009_s16 = sphi %s1064_s16, %s1445_s16   ;;  %s1005_s15 = sphi %s1062_s15, %s1444_s15  }
   0xd   : > { %s46_s23 = sadd.s32 1, %s1021_s19  ;;  %s57_s24 = sadd.s32 1, %s1013_s17 }
   0xe   : > { %p48_p0 = scmp.ge.s32.totalorder %s46_s23, 2  ;;  %p64_p1 = scmp.ne.s32.totalorder %s1013_s17, %s1009_s16 }
   0xf   : > { %p65_p2 = scmp.eq.s32.totalorder %s1025_s20, 0  ;;  %p70_p3 = scmp.ne.s32.totalorder %s1009_s16, %s1005_s15 }
  0x10   : > { %s1450_s23 = smov (%p48_p0, %s46_s23), 0  ;;  %p71_p5 = scmp.eq.s32.totalorder %s1093_s21, 0 }
  0x11   : > { %1424 = sst [smem:[#allocation15_spill]] %s1450_s23  ;;  %p1105_p4 = por %p65_p2, %p64_p1 }
  0x12   : > { %s52_s26 = ssub.s32 %s1021_s19, %s1450_s23  ;;  %p126_p6 = scmp.eq.s32.totalorder %s1093_s21, 1 }
  0x13   : > { %p55_p7 = scmp.eq.s32.totalorder %s52_s26, 0  ;;  %p1113_p8 = por %p71_p5, %p70_p3 }
  0x14   : > { %p1117_p9 = por %p126_p6, %p64_p1  ;;  %p132_p10 = scmp.eq.s32.totalorder %s1421_s22, 1 }
  0x15   : > { %s1124_s29 = scalar_select %p55_p7, %s1013_s17, %s57_s24  }
  0x16   : > { %p1126_p11 = por %p132_p10, %p70_p3  ;;  %p687_p12 = scmp.ge.s32.totalorder %s1025_s20, 2 }
  0x17   : > { %1428 = sst [smem:[#allocation16_spill]] %s1124_s29  ;;  %p762_p13 = scmp.lt.s32.totalorder %s1025_s20, 2 }
  0x18   : > { %s1133_s5 = sand.u32 1, %s1013_s17   ;;  %s731_s7 = sshll.u32 %s1021_s19, 9 }
  0x19   : > { %s688_s6 = sshll.u32 %s1133_s5, 5  ;;  %s1430_s0 = sld [smem:[#allocation17_spill]] }
  0x1a   : > { %s212_s11 = scalar_lea.vmem [#allocation2], %s688_s6  ;;  %p1142_p0 = pnand %p762_p13, %p1105_p4 }
  0x1b   : > { %s221_s12 = sshll.u32 %s212_s11, 4  ;;  %p693_p1 = scmp.ge.s32.totalorder %s1025_s20, 1  ;;  %s222_s12 = int_to_ptr.vmem [resolvable:$true] %s221_s12 }
  0x1c   : > { %s209_s14 = scalar_lea.sflag [#allocation3], %s1133_s5  ;;  %p831_p2 = pneg %p1142_p0 }
  0x1d   : > { %s842_s24 = scalar_lea.vmem %s222_s12, 512  ;;  %s1027_s26 = smov [#allocation2]  }
  0x1e   : > { %p843_p3 = scmp.ne.s32.totalorder %s222_s12, %s842_s24  ;;  %s847_s6 = sshll.u32 %s1027_s26, 4  ;;  %s848_s6 = int_to_ptr.vmem [resolvable:$false] %s847_s6 }
  0x1f   : > { %s220_s10 = scalar_lea.hbm %s1430_s0, %s731_s7  ;;  %s849_s25 = scalar_lea.vmem %s848_s6, 1024 }
  0x20   : > { %p845_p5 = pnand %p843_p3, %p831_p2  ;;  %p850_p4 = scmp.lt.s32.totalorder %s222_s12, %s848_s6 }
  0x21   : > { %p851_p7 = scmp.lt.s32.totalorder %s849_s25, %s842_s24 }
  0x22   : > { %p846_p6 = pneg %p845_p5 }
  0x23   : > { %p852_p10 = por %p851_p7, %p850_p4 }
  0x25   : > { %p853_p13 = pnand %p852_p10, %p846_p6 }
  0x27   : > { %856 = shalt.err (!%p853_p13)
}
  0x28   : > { %s1028_s7 = smov 128   ;;  %s1029_s8 = smov 8  }
  0x29   : > { %748 = dma.hbm_to_vmem [thread:$0]  (!%p1142_p0), %s220_s10, 512, %s222_s12, %s209_s14, %s1028_s7, %s1028_s7, %s1029_s8  }
  0x2a   : > { %p249_p3 = scmp.lt.s32.totalorder %s1025_s20, 3  ;;  %s691_s9 = sshll.u32 %s1133_s5, 3 }
  0x2b   : > { %s692_s11 = sshll.u32 %s1021_s19, 7  ;;  %s235_s22 = scalar_lea.vmem [#allocation5], %s691_s9 }
  0x2c   : > { %p1160_p5 = pnand %p693_p1, %p249_p3  ;;  %s242_s25 = scalar_lea.hbm %s1417_s1, %s692_s11 }
  0x2d   : > { %s244_s0 = sshll.u32 %s235_s22, 4  ;;  %s232_s23 = scalar_lea.sflag [#allocation6], %s1133_s5  ;;  %s245_s0 = int_to_ptr.vmem [resolvable:$true] %s244_s0 }
  0x2e   : > { %s870_s29 = scalar_lea.vmem %s245_s0, 128  ;;  %s1030_s10 = smov [#allocation5]  }
  0x2f   : > { %p871_p6 = scmp.ne.s32.totalorder %s245_s0, %s870_s29  ;;  %s875_s12 = sshll.u32 %s1030_s10, 4  ;;  %s876_s12 = int_to_ptr.vmem [resolvable:$false] %s875_s12 }
  0x30   : > { %s877_s14 = scalar_lea.vmem %s876_s12, 256  ;;  %p878_p1 = scmp.lt.s32.totalorder %s245_s0, %s876_s12 }
  0x31   : > { %p873_p4 = pnand %p871_p6, %p831_p2  ;;  %p879_p10 = scmp.lt.s32.totalorder %s877_s14, %s870_s29 }
  0x33   : > { %p874_p7 = pneg %p873_p4  ;;  %p880_p13 = por %p879_p10, %p878_p1 }
  0x35   : > { %p881_p3 = pnand %p880_p13, %p874_p7 }
  0x37   : > { %884 = shalt.err (!%p881_p3)
}
  0x38   : > { %751 = dma.hbm_to_vmem [thread:$0]  (!%p1142_p0), %s242_s25, 128, %s245_s0, %s232_s23  }
  0x39   : > { %253 = sbr.rel (%p1160_p5) target bundleno = 178 (0xb2), region = 28  ;;  %s1176_s22 = sand.u32 (!%p1160_p5), 1, %s1009_s16  }
  0x3a   : > { %s1179_s5 = sshll.u32 (!%p1160_p5), %s1176_s22, 5  ;;  %s256_s7 = scalar_lea.sflag (!%p1160_p5), [#allocation3], %s1176_s22 }
  0x3b   : > { %s259_s29 = scalar_lea.vmem (!%p1160_p5), [#allocation2], %s1179_s5 }
  0x3e   : > { %988 = dma.done.wait (%p1113_p8), %s256_s7, 512  }
  0x3f   : > { %990 = vsyncadd (%p1113_p8), %s256_s7, 4294966784  ;;  %s695_s0 = sshll.u32 %s1176_s22, 3  ;;  %s265_s23 = scalar_lea.sflag [#allocation6], %s1176_s22 }
  0x40   : > { %s268_s13 = scalar_lea.vmem [#allocation5], %s695_s0 }
  0x41   : > { %992 = dma.done.wait (%p1113_p8), %s265_s23, 128  }
  0x42   : > { %994 = vsyncadd (%p1113_p8), %s265_s23, 4294967168  ;;  %v358_v0 = vlaneseq  ;;  %v326_v5 = vld [vmem:[%s268_s13] sm:$0xff]  ;;  %v1199_v8 = vld [vmem:[%s259_s29 + $0x10] sm:$0xff]  ;;  %v1031_v14 = vmov 0.0   ;;  %s1239_s27 = scalar_lea.vmem [#allocation10], %s1179_s5  ;;  %s1252_s8 = sshll.u32 %s1017_s18, 9 }
  0x43   : > { %v1195_v6 = vld [vmem:[%s259_s29] sm:$0xff]  ;;  %v1197_v7 = vld [vmem:[%s259_s29 + $0x8] sm:$0xff]  ;;  %vm372_vm1 = vcmp.eq.s32.totalorder %v326_v5, 0  ;;  %vm389_vm2 = vcmp.eq.s32.totalorder %v326_v5, 1  ;;  %v1204_v10 = vld [vmem:[%s259_s29 + $0x18] sm:$0xff]  ;;  %vm408_vm4 = vcmp.eq.s32.totalorder %v326_v5, 2  ;;  %s1268_s6 = scalar_lea.hbm %s1418_s2, %s1252_s8 }
  0x44   : > { %v359_v1 = vshrl.u32 %v358_v0, 7  ;;  %v361_v2 = vand.u32 127, %v358_v0  ;;  %v334_v9 = vmax.f32 %v1195_v6, %v1197_v7  ;;  %vm427_vm5 = vcmp.eq.s32.totalorder %v326_v5, 3  ;;  %s293_s9 = scalar_lea.vmem [#allocation7], %s1179_s5  ;;  %s445_s24 = sand.u32 1, %s1093_s21  }
  0x45   : > { %s466_s11 = sshll.u32 %s293_s9, 4  ;;  %s1277_s25 = scalar_lea.vmem [#allocation8], %s1179_s5  ;;  %s1270_s11 = int_to_ptr.vmem [resolvable:$true] %s466_s11 }
  0x46   : > { %v362_v3 = vmul.u32 128, %v359_v1  ;;  %v335_v12 = vmax.f32 %v334_v9, %v1199_v8  ;;  %s484_s10 = sshll.u32 %s1277_s25, 4  ;;  %s502_s12 = sshll.u32 %s1239_s27, 4  ;;  %s1323_s10 = int_to_ptr.vmem [resolvable:$true] %s484_s10  ;;  %s1333_s12 = int_to_ptr.vmem [resolvable:$true] %s502_s12 }
  0x47   : > { %s441_s14 = scalar_lea.sflag [#allocation4], %s1176_s22  ;;  %s885_s5 = scalar_lea.vmem %s1270_s11, 512 }
  0x48   : > { %v1193_v4 = vadd.s32 %v362_v3, %v361_v2  ;;  %v336_v18 = vmax.f32 %v335_v12, %v1204_v10  ;;  %p886_p8 = scmp.ne.s32.totalorder %s1270_s11, %s885_s5  ;;  %s1032_s7 = smov [#allocation7]  }
  0x49   : > { %s889_s29 = sshll.u32 %s1032_s7, 4  ;;  %s890_s29 = int_to_ptr.vmem [resolvable:$false] %s889_s29 }
  0x4a   : > { %vm366_vm0 = vcmp.lt.s32.totalorder %v1193_v4, 256  ;;  %v337_v22 = vsub.f32 %v1195_v6, %v336_v18  ;;  %v340_v23 = vsub.f32 %v1197_v7, %v336_v18  ;;  %v343_v24 = vsub.f32 %v1199_v8, %v336_v18  ;;  %p887_p0 = pnand %p886_p8, %p1117_p9  ;;  %s891_s0 = scalar_lea.vmem %s890_s29, 1024 }
  0x4b   : > { %vm1208_vm3 = vmand %vm372_vm1, %vm366_vm0  ;;  %v346_v25 = vsub.f32 %v1204_v10, %v336_v18  ;;  %p892_p5 = scmp.lt.s32.totalorder %s1270_s11, %s890_s29  ;;  %p893_p6 = scmp.lt.s32.totalorder %s891_s0, %s885_s5 }
  0x4c   : > { %vm1215_vm6 = vmand %vm389_vm2, %vm366_vm0  ;;  %v380_v15 = vsel %vm1208_vm3, 1.0, %v1031_v14  ;;  %v338_v26 = vmul.f32 1.442695, %v337_v22  ;;  %v341_v27 = vmul.f32 1.442695, %v340_v23  ;;  %p888_p2 = pneg %p887_p0 }
  0x4d   : > { %vm1223_vm7 = vmand %vm408_vm4, %vm366_vm0  ;;  %v399_v17 = vsel %vm1215_vm6, 1.0, %v1031_v14  ;;  %382 = vst [vmem:[%s1239_s27] sm:$0xff] %v380_v15  ;;  %v344_v28 = vmul.f32 1.442695, %v343_v24  ;;  %v347_v29 = vmul.f32 1.442695, %v346_v25  ;;  %p894_p4 = por %p893_p6, %p892_p5 }
  0x4e   : > { %vm1232_vm8 = vmand %vm427_vm5, %vm366_vm0  ;;  %v418_v20 = vsel %vm1223_vm7, 1.0, %v1031_v14  ;;  %707 = vst [vmem:[%s1239_s27 + $0x8] sm:$0xff] %v399_v17  ;;  %817 = vpow2.f32 %v338_v26 }
  0x4f   : > { %v437_v21 = vsel %vm1232_vm8, 1.0, %v1031_v14  ;;  %713 = vst [vmem:[%s1239_s27 + $0x10] sm:$0xff] %v418_v20  ;;  %819 = vpow2.f32 %v341_v27  ;;  %p895_p7 = pnand %p894_p4, %p888_p2 }
  0x50   : > { %719 = vst [vmem:[%s1239_s27 + $0x18] sm:$0xff] %v437_v21  ;;  %821 = vpow2.f32 %v344_v28 }
  0x51   : > { %823 = vpow2.f32 %v347_v29 }
  0x5b   : > { %v818_v30 = vpop.eup %817 }
  0x5c   : > { %v820_v31 = vpop.eup %819 }
  0x5d   : > { %v822_v32 = vpop.eup %821  ;;  %v349_v33 = vadd.f32 %v820_v31, %v818_v30 }
  0x5e   : > { %v824_v34 = vpop.eup %823 }
  0x5f   : > { %v350_v35 = vadd.f32 %v822_v32, %v349_v33 }
  0x61   : > { %v351_v36 = vadd.f32 %v824_v34, %v350_v35 }
  0x63   : > { %825 = vrcp.f32 %v351_v36 }
  0x64   : > { %827 = vlog2.f32 %v351_v36 }
  0x70   : > { %v826_v37 = vpop.eup %825 }
  0x71   : > { %v828_v38 = vpop.eup %827  ;;  %v367_v39 = vmul.f32 %v826_v37, %v818_v30  ;;  %v383_v40 = vmul.f32 %v826_v37, %v820_v31  ;;  %v402_v41 = vmul.f32 %v826_v37, %v822_v32  ;;  %v421_v42 = vmul.f32 %v826_v37, %v824_v34 }
  0x72   : > { %v354_v43 = vmul.f32 0.6931472, %v828_v38 }
  0x73   : > { %v368_v44 = vsel %vm366_vm0, %v367_v39, 0.0  ;;  %v384_v45 = vsel %vm366_vm0, %v383_v40, 0.0  ;;  %v403_v46 = vsel %vm366_vm0, %v402_v41, 0.0  ;;  %v422_v47 = vsel %vm366_vm0, %v421_v42, 0.0 }
  0x74   : > { %v355_v48 = vadd.f32 %v354_v43, %v336_v18  ;;  %371 = vst [vmem:[%s293_s9] sm:$0xff] %v368_v44  ;;  %703 = vst [vmem:[%s293_s9 + $0x8] sm:$0xff] %v384_v45 }
  0x75   : > { %709 = vst [vmem:[%s293_s9 + $0x10] sm:$0xff] %v403_v46  ;;  %715 = vst [vmem:[%s293_s9 + $0x18] sm:$0xff] %v422_v47 }
  0x76   : > { %v375_v49 = vsub.f32 %v355_v48, %v1195_v6  ;;  %v393_v50 = vsub.f32 %v355_v48, %v1197_v7  ;;  %v412_v51 = vsub.f32 %v355_v48, %v1199_v8  ;;  %v431_v52 = vsub.f32 %v355_v48, %v1204_v10 }
  0x78   : > { %v376_v53 = vsel %vm1208_vm3, %v375_v49, 0.0  ;;  %v394_v54 = vsel %vm1215_vm6, %v393_v50, 0.0  ;;  %v413_v55 = vsel %vm1223_vm7, %v412_v51, 0.0  ;;  %v432_v56 = vsel %vm1232_vm8, %v431_v52, 0.0 }
  0x79   : > { %898 = shalt.err (!%p895_p7)
}
  0x7a   : > { %s899_s23 = scalar_lea.hbm %s1268_s6, 512  ;;  %s903_s18 = scalar_lea.hbm %s1418_s2, 1024 }
  0x7b   : > { %p900_p1 = scmp.ne.s32.totalorder %s1268_s6, %s899_s23  ;;  %p904_p3 = scmp.lt.s32.totalorder %s1268_s6, %s1418_s2 }
  0x7c   : > { %p905_p8 = scmp.lt.s32.totalorder %s903_s18, %s899_s23 }
  0x7d   : > { %p901_p10 = pnand %p900_p1, %p1117_p9 }
  0x7e   : > { %p906_p0 = por %p905_p8, %p904_p3 }
  0x7f   : > { %p902_p13 = pneg %p901_p10 }
  0x81   : > { %p907_p2 = pnand %p906_p0, %p902_p13 }
  0x83   : > { %910 = shalt.err (!%p907_p2)
}
  0x84   : > { %s1033_s5 = smov 128   ;;  %s1034_s29 = smov 8   ;;  %378 = vst [vmem:[%s1277_s25] sm:$0xff] %v376_v53  ;;  %705 = vst [vmem:[%s1277_s25 + $0x8] sm:$0xff] %v394_v54 }
  0x85   : > { %739 = dma.vmem_to_hbm [thread:$0]  (%p1117_p9), %s1270_s11, 512, %s1268_s6, %s441_s14, %s1033_s5, %s1033_s5, %s1034_s29  }
  0x86   : > { %s1319_s13 = scalar_lea.hbm %s1419_s3, %s1252_s8  ;;  %s1329_s26 = scalar_lea.hbm %s1420_s4, %s1252_s8  ;;  %711 = vst [vmem:[%s1277_s25 + $0x10] sm:$0xff] %v413_v55  ;;  %717 = vst [vmem:[%s1277_s25 + $0x18] sm:$0xff] %v432_v56 }
  0x87   : > { %s1341_s22 = scalar_lea.sflag [#allocation9], %s445_s24  ;;  %s911_s11 = scalar_lea.vmem %s1323_s10, 512 }
  0x88   : > { %p912_p5 = scmp.ne.s32.totalorder %s1323_s10, %s911_s11  ;;  %s1035_s6 = smov [#allocation8]  }
  0x89   : > { %s915_s14 = sshll.u32 %s1035_s6, 4  ;;  %s916_s14 = int_to_ptr.vmem [resolvable:$false] %s915_s14 }
  0x8a   : > { %p913_p6 = pnand %p912_p5, %p1117_p9  ;;  %s917_s8 = scalar_lea.vmem %s916_s14, 1024 }
  0x8b   : > { %p918_p7 = scmp.lt.s32.totalorder %s1323_s10, %s916_s14  ;;  %p919_p1 = scmp.lt.s32.totalorder %s917_s8, %s911_s11 }
  0x8c   : > { %p914_p4 = pneg %p913_p6 }
  0x8d   : > { %p920_p10 = por %p919_p1, %p918_p7 }
  0x8f   : > { %p921_p13 = pnand %p920_p10, %p914_p4 }
  0x91   : > { %924 = shalt.err (!%p921_p13)
}
  0x92   : > { %s925_s21 = scalar_lea.hbm %s1319_s13, 512  ;;  %s929_s25 = scalar_lea.hbm %s1419_s3, 1024 }
  0x93   : > { %p926_p3 = scmp.ne.s32.totalorder %s1319_s13, %s925_s21  ;;  %p930_p2 = scmp.lt.s32.totalorder %s1319_s13, %s1419_s3 }
  0x94   : > { %p931_p5 = scmp.lt.s32.totalorder %s929_s25, %s925_s21 }
  0x95   : > { %p927_p8 = pnand %p926_p3, %p1117_p9 }
  0x96   : > { %p932_p6 = por %p931_p5, %p930_p2 }
  0x97   : > { %p928_p0 = pneg %p927_p8 }
  0x99   : > { %p933_p4 = pnand %p932_p6, %p928_p0 }
  0x9b   : > { %936 = shalt.err (!%p933_p4)
}
  0x9c   : > { %740 = dma.vmem_to_hbm [thread:$0]  (%p1117_p9), %s1323_s10, 512, %s1319_s13, %s1341_s22, %s1033_s5, %s1033_s5, %s1034_s29  }
  0x9d   : > { %s937_s23 = scalar_lea.vmem %s1333_s12, 512  ;;  %s1036_s9 = smov [#allocation10]  }
  0x9e   : > { %p938_p7 = scmp.ne.s32.totalorder %s1333_s12, %s937_s23  ;;  %s941_s18 = sshll.u32 %s1036_s9, 4  ;;  %s942_s18 = int_to_ptr.vmem [resolvable:$false] %s941_s18 }
  0x9f   : > { %s943_s11 = scalar_lea.vmem %s942_s18, 1024  ;;  %p944_p13 = scmp.lt.s32.totalorder %s1333_s12, %s942_s18 }
  0xa0   : > { %p939_p1 = pnand %p938_p7, %p1117_p9  ;;  %p945_p3 = scmp.lt.s32.totalorder %s943_s11, %s937_s23 }
  0xa2   : > { %p940_p10 = pneg %p939_p1  ;;  %p946_p8 = por %p945_p3, %p944_p13 }
  0xa4   : > { %p947_p0 = pnand %p946_p8, %p940_p10 }
  0xa6   : > { %950 = shalt.err (!%p947_p0)
}
  0xa7   : > { %s951_s6 = scalar_lea.hbm %s1329_s26, 512  ;;  %s955_s14 = scalar_lea.hbm %s1420_s4, 1024 }
  0xa8   : > { %p952_p2 = scmp.ne.s32.totalorder %s1329_s26, %s951_s6  ;;  %p956_p4 = scmp.lt.s32.totalorder %s1329_s26, %s1420_s4 }
  0xa9   : > { %p957_p7 = scmp.lt.s32.totalorder %s955_s14, %s951_s6 }
  0xaa   : > { %p953_p5 = pnand %p952_p2, %p1117_p9 }
  0xab   : > { %p958_p1 = por %p957_p7, %p956_p4 }
  0xac   : > { %p954_p6 = pneg %p953_p5 }
  0xae   : > { %p959_p10 = pnand %p958_p1, %p954_p6 }
  0xb0   : > { %962 = shalt.err (!%p959_p10)
}
  0xb1   : > { %741 = dma.vmem_to_hbm [thread:$0]  (%p1117_p9), %s1333_s12, 512, %s1329_s26, %s1341_s22, %s1033_s5, %s1033_s5, %s1034_s29  }
  0xb2 PF: > { %s517_s27 = sand.u32 1, %s1005_s15   ;;  %p753_p13 = pnand %p687_p12, %p1126_p11 }
  0xb3   : > { %s518_s24 = scalar_lea.sflag [#allocation4], %s517_s27 }
  0xb4   : > { %p754_p3 = pneg %p753_p13 }
  0xb6   : > { %996 = dma.done.wait (%p754_p3), %s518_s24, 512  }
  0xb7   : > { %998 = vsyncadd (%p754_p3), %s518_s24, 4294966784  ;;  %s1441_s28 = sadd.s32 4294967294, %s1025_s20  }
  0xb8   : > { %s526_s25 = sand.u32 1, %s1441_s28  }
  0xb9   : > { %s527_s7 = scalar_lea.sflag [#allocation9], %s526_s25 }
  0xba   : > { %1000 = dma.done.wait (%p754_p3), %s527_s7, 1024  }
  0xbb   : > { %1002 = vsyncadd (%p754_p3), %s527_s7, 4294966272  ;;  %s27_s20 = sadd.s32 1, %s1025_s20   ;;  %s1442_s12 = sld [smem:[#allocation16_spill]] }
  0xbc   : > { %p24_p9 = scmp.ge.s32.totalorder %s27_s20, 4   ;;  %s1443_s30 = sld [smem:[#allocation15_spill]] }
  0xbd   : > { %s1444_s15 = smov %s1009_s16  ;;  %s1445_s16 = smov %s1013_s17 }
  0xbe   : > { %s1447_s18 = smov %s1021_s19  ;;  %26 = sbr.rel (!%p24_p9) target bundleno = 12 (0xc), region = 134 }
  0xc1   : > { %s1446_s17 = smov %s1442_s12 }
  0xc2   : > { %s1448_s19 = smov %s1443_s30 }
  0xc3   :  { %541 = vsyncpa [#allocation3], 1 }
  0xc4   :  { %543 = vsyncpa [#allocation3 + $0x1], 1 }
  0xc5   :  { %544 = vsyncpa [#allocation6], 1 }
  0xc6   :  { %546 = vsyncpa [#allocation6 + $0x1], 1 }
  0xc7   :  { %547 = vsyncpa [#allocation4], 1 }
  0xc8   :  { %549 = vsyncpa [#allocation4 + $0x1], 1 }
  0xc9   :  { %550 = vsyncpa [#allocation9], 1 }
  0xca   :  { %552 = vsyncpa [#allocation9 + $0x1], 1 }

</bundles_post_ra>
